<compile_context>
chip_gen: v7x
topology: tpu7x:2x2x1
jax: 0.10.0
libtpu: 0.0.40
codegen_flags: <defaults>
</compile_context>

<pallas_src>
import functools

import jax
import jax.numpy as jnp
from jax.experimental import pallas as pl
from jax.experimental.pallas import tpu as pltpu


def _shuffle_kernel(x_ref, o_ref, *, groups):
    # x_ref: (1, g, cpg_t, HW)  -- input viewed as  (N, g,   cpg, H*W), chunked on cpg
    # o_ref: (1, cpg_t, g, HW)  -- output viewed as (N, cpg, g,   H*W), chunked on cpg
    # Channel shuffle == swap of the (g, cpg) axes; expressed as `g` static
    # slice copies (sublane moves in VMEM, hidden under the HBM DMAs).
    for i in range(groups):
        o_ref[0, :, i, :] = x_ref[0, i, :, :]


def _pick_cpg_tile(cpg, g, hw, itemsize, budget_bytes):
    """Largest divisor of cpg whose double-buffered in+out blocks fit the budget."""
    # sublane tile rows: 8 (32-bit), 16 (16-bit), 32 (8-bit)
    sublane = 8 * (4 // itemsize) if itemsize in (1, 2, 4) else 8
    g_pad = -(-g // sublane) * sublane  # out-block sublane dim padded in VMEM

    def live_bytes(t):
        in_blk = g * t * hw * itemsize
        out_blk = t * g_pad * hw * itemsize
        return 2 * (in_blk + out_blk)  # x2 for double buffering

    for d in range(cpg, 0, -1):
        if cpg % d == 0 and live_bytes(d) <= budget_bytes:
            return d
    return 1


def shuffle_block(x: jax.Array, groups: int,
                  *, vmem_budget_bytes: int = 16 * 1024 * 1024) -> jax.Array:
    """Channel shuffle: [N,C,H,W] -> [N,g,C/g,H,W] -> permute -> [N,C,H,W]."""
    N, C, H, W = x.shape
    g = int(groups)
    assert C % g == 0, "C must be divisible by groups"
    cpg = C // g
    HW = H * W
    itemsize = jnp.dtype(x.dtype).itemsize

    # Lane-dense layout: flatten H*W into the last dim (free contiguous reshape).
    x_v = x.reshape(N, g, cpg, HW)

    cpg_t = _pick_cpg_tile(cpg, g, HW, itemsize, vmem_budget_bytes)
    n_chunks = cpg // cpg_t

    kernel = functools.partial(_shuffle_kernel, groups=g)

    y_v = pl.pallas_call(
        kernel,
        out_shape=jax.ShapeDtypeStruct((N, cpg, g, HW), x.dtype),
        grid=(N, n_chunks),
        in_specs=[pl.BlockSpec((1, g, cpg_t, HW), lambda n, c: (n, 0, c, 0))],
        out_specs=pl.BlockSpec((1, cpg_t, g, HW), lambda n, c: (n, c, 0, 0)),
        compiler_params=pltpu.CompilerParams(
            dimension_semantics=("parallel", "parallel"),
            vmem_limit_bytes=32 * 1024 * 1024,
        ),
        cost_estimate=pl.CostEstimate(
            flops=0,
            transcendentals=0,
            bytes_accessed=2 * N * C * HW * itemsize,
        ),
    )(x_v)

    # Free contiguous reshape back to NCHW: (N, cpg, g, HW) -> (N, C, H, W),
    # channel index (j, i) -> j*g + i, matching the PyTorch permute+reshape.
    return y_v.reshape(N, C, H, W)


def shuffle_block_ref(x: jax.Array, groups: int) -> jax.Array:
    """Pure-JAX reference mirroring the PyTorch forward exactly."""
    N, C, H, W = x.shape
    g = groups
    return (
        x.reshape(N, g, C // g, H, W)
        .transpose(0, 2, 1, 3, 4)
        .reshape(N, C, H, W)
    )


if __name__ == "__main__":
    # ShuffleBlock has no learnable parameters; `groups` is its only config.
    key = jax.random.PRNGKey(0)

    configs = [
        ((2, 4, 16, 16), 2),   # spec-consistent small shape
        ((1, 8, 8, 8), 4),     # different group count
    ]

    for shape, groups in configs:
        x = jax.random.normal(key, shape, dtype=jnp.float32)
        y = shuffle_block(x, groups)
        jax.block_until_ready(y)

        y_ref = shuffle_block_ref(x, groups)
        assert y.shape == x.shape
        assert y.dtype == x.dtype
        assert bool(jnp.array_equal(y, y_ref)), (
            f"Pallas channel shuffle mismatch for shape={shape}, groups={groups}")

    print("KERNEL_OK")
</pallas_src>

<mosaic_0001>
module attributes {stable_mosaic.version = 11 : i64} {
  func.func @_shuffle_kernel(%arg0: i32, %arg1: i32, %arg2: memref<1x2x2x256xf32, #tpu.memory_space<vmem>>, %arg3: memref<1x2x2x256xf32, #tpu.memory_space<vmem>>) attributes {dimension_semantics = [#tpu.dimension_semantics<parallel>, #tpu.dimension_semantics<parallel>], iteration_bounds = array<i64: 2, 1>, scalar_prefetch = 0 : i64, scratch_operands = 0 : i64, tpu.core_type = #tpu.core_type<tc>, window_params = [{transform_indices = @transform_0, window_bounds = array<i64: 1, 2, 2, 256>}, {transform_indices = @transform_1, window_bounds = array<i64: 1, 2, 2, 256>}]} {
    %c0 = arith.constant 0 : index
    %c0_0 = arith.constant 0 : index
    %c0_1 = arith.constant 0 : index
    %c0_2 = arith.constant 0 : index
    %0 = vector.load %arg2[%c0, %c0_0, %c0_1, %c0_2] : memref<1x2x2x256xf32, #tpu.memory_space<vmem>>, vector<1x1x2x256xf32>
    %1 = vector.shape_cast %0 : vector<1x1x2x256xf32> to vector<2x256xf32>
    %c0_3 = arith.constant 0 : index
    %c0_4 = arith.constant 0 : index
    %c0_5 = arith.constant 0 : index
    %c0_6 = arith.constant 0 : index
    %2 = vector.load %arg3[%c0_3, %c0_4, %c0_5, %c0_6] : memref<1x2x2x256xf32, #tpu.memory_space<vmem>>, vector<1x2x1x256xf32>
    %3 = vector.shape_cast %2 : vector<1x2x1x256xf32> to vector<2x256xf32>
    %4 = vector.shape_cast %1 : vector<2x256xf32> to vector<1x2x1x256xf32>
    tpu.vector_store %arg3[%c0_3, %c0_4, %c0_5, %c0_6], %4 {strides = array<i32>} : memref<1x2x2x256xf32, #tpu.memory_space<vmem>>, vector<1x2x1x256xf32>,
    %c0_7 = arith.constant 0 : index
    %c1 = arith.constant 1 : index
    %c0_8 = arith.constant 0 : index
    %c0_9 = arith.constant 0 : index
    %5 = vector.load %arg2[%c0_7, %c1, %c0_8, %c0_9] : memref<1x2x2x256xf32, #tpu.memory_space<vmem>>, vector<1x1x2x256xf32>
    %6 = vector.shape_cast %5 : vector<1x1x2x256xf32> to vector<2x256xf32>
    %c0_10 = arith.constant 0 : index
    %c0_11 = arith.constant 0 : index
    %c1_12 = arith.constant 1 : index
    %c0_13 = arith.constant 0 : index
    %7 = vector.load %arg3[%c0_10, %c0_11, %c1_12, %c0_13] : memref<1x2x2x256xf32, #tpu.memory_space<vmem>>, vector<1x2x1x256xf32>
    %8 = vector.shape_cast %7 : vector<1x2x1x256xf32> to vector<2x256xf32>
    %9 = vector.shape_cast %6 : vector<2x256xf32> to vector<1x2x1x256xf32>
    tpu.vector_store %arg3[%c0_10, %c0_11, %c1_12, %c0_13], %9 {strides = array<i32>} : memref<1x2x2x256xf32, #tpu.memory_space<vmem>>, vector<1x2x1x256xf32>,
    return
  }
  func.func @transform_0(%arg0: i32, %arg1: i32) -> (i32, i32, i32, i32) {
    %c0_i32 = arith.constant 0 : i32
    %c0_i32_0 = arith.constant 0 : i32
    %c0_i32_1 = arith.constant 0 : i32
    return %arg0, %c0_i32, %arg1, %c0_i32_0 : i32, i32, i32, i32
  }
  func.func @transform_1(%arg0: i32, %arg1: i32) -> (i32, i32, i32, i32) {
    %c0_i32 = arith.constant 0 : i32
    %c0_i32_0 = arith.constant 0 : i32
    %c0_i32_1 = arith.constant 0 : i32
    return %arg0, %arg1, %c0_i32, %c0_i32_0 : i32, i32, i32, i32
  }
}

</mosaic_0001>

<bundles_post_ra>
// kernel: tpu_custom_call.1
= control target key start
LH: loop header
LB: loop body
LE: loop exit
PB: predicated region body
PF: predicated region fallthrough
CT: control target
= control target key end

     0   :  { %6 = vsyncpa [#allocation3], 0  ;;  %s688_s0 = inlined_call_operand.hbm [shape: f32[2,2,2,256], index: 0, kind: input, shape index: {}]   ;;  %s689_s1 = inlined_call_operand.hbm [shape: f32[2,2,2,256], index: 1, kind: output, shape index: {}]  }
   0x1   :  { %8 = vsyncpa [#allocation3 + $0x1], 0 }
   0x2   :  { %9 = vsyncpa [#allocation4], 0 }
   0x3   :  { %11 = vsyncpa [#allocation4 + $0x1], 0  ;;  %s513_s6 = smov 0   ;;  %s515_s7 = smov 0  }
   0x4   :  { %s517_s8 = smov 0   ;;  %s519_s9 = smov 0  }
   0x5   :  { %s521_s10 = smov 0   ;;  %s523_s11 = smov 0  }
   0x6 LB: > { %s294_s12 = sadd.s32 4294967295, %s495_s11   ;;  %s295_s13 = sadd.s32 4294967294, %s495_s11   ;;  %s495_s11 = sphi %s523_s11, %s17_s11   ;;  %s491_s10 = sphi %s521_s10, %s704_s10   ;;  %s487_s9 = sphi %s519_s9, %s703_s9   ;;  %s483_s8 = sphi %s517_s8, %s702_s8   ;;  %s479_s7 = sphi %s515_s7, %s701_s7   ;;  %s475_s6 = sphi %s513_s6, %s700_s6  }
   0x7   : > { %s29_s14 = sadd.s32 1, %s491_s10  ;;  %s38_s15 = sadd.s32 1, %s483_s8 }
   0x8   : > { %p31_p0 = scmp.ge.s32.totalorder %s29_s14, 2  ;;  %p45_p1 = scmp.ne.s32.totalorder %s483_s8, %s479_s7 }
   0x9   : > { %p46_p2 = scmp.eq.s32.totalorder %s495_s11, 0  ;;  %p51_p3 = scmp.ne.s32.totalorder %s479_s7, %s475_s6 }
   0xa   : > { %s706_s14 = smov (%p31_p0, %s29_s14), 0  ;;  %p52_p5 = scmp.eq.s32.totalorder %s294_s12, 0 }
   0xb   : > { %p554_p4 = por %p46_p2, %p45_p1  ;;  %s33_s17 = ssub.s32 %s491_s10, %s706_s14 }
   0xc   : > { %p77_p6 = scmp.eq.s32.totalorder %s294_s12, 1  ;;  %p36_p7 = scmp.eq.s32.totalorder %s33_s17, 0 }
   0xd   : > { %p560_p8 = por %p52_p5, %p51_p3  ;;  %p83_p10 = scmp.eq.s32.totalorder %s295_s13, 1 }
   0xe   : > { %p564_p9 = por %p77_p6, %p45_p1  ;;  %p329_p13 = scmp.lt.s32.totalorder %s495_s11, 2 }
   0xf   : > { %s569_s20 = scalar_select %p36_p7, %s483_s8, %s38_s15  }
  0x10   : > { %s693_s19 = scalar_select %p564_p9, 1, 0 }
  0x11   : > { %p571_p11 = por %p83_p10, %p51_p3  ;;  %s103_s22 = sand.u32 1, %s483_s8  }
  0x12   : > { %s298_s23 = sshll.u32 %s103_s22, 3  ;;  %s315_s24 = sshll.u32 %s491_s10, 7 }
  0x13   : > { %s694_s21 = scalar_select %p571_p11, 1, 0 }
  0x14   : > { %s582_s27 = scalar_lea.hbm %s688_s0, %s315_s24  ;;  %s107_s28 = scalar_lea.vmem [#allocation2], %s298_s23 }
  0x15   : > { %s116_s29 = sshll.u32 %s107_s28, 4  ;;  %p588_p0 = pnand %p329_p13, %p554_p4  ;;  %s584_s29 = int_to_ptr.vmem [resolvable:$true] %s116_s29 }
  0x16   : > { %s593_s2 = scalar_lea.sflag [#allocation3], %s103_s22  ;;  %s383_s3 = scalar_lea.hbm %s582_s27, 128 }
  0x17   : > { %p384_p2 = scmp.ne.s32.totalorder %s582_s27, %s383_s3  ;;  %p385_p3 = pneg %p588_p0 }
  0x18   : > { %s388_s12 = scalar_lea.hbm %s688_s0, 256  ;;  %p389_p4 = scmp.lt.u32.totalorder %s582_s27, %s688_s0 }
  0x19   : > { %p386_p5 = pnand %p385_p3, %p384_p2  ;;  %p390_p7 = scmp.lt.u32.totalorder %s388_s12, %s383_s3 }
  0x1a   : > { %p392_p13 = scmp.lt.u32.totalorder %s383_s3, %s582_s27 }
  0x1b   : > { %p387_p6 = pneg %p386_p5  ;;  %p391_p10 = por %p390_p7, %p389_p4 }
  0x1d   : > { %p393_p12 = por %p392_p13, %p391_p10 }
  0x1f   : > { %p394_p1 = pnand %p393_p12, %p387_p6 }
  0x21   : > { %397 = shalt.err (!%p394_p1)
}
  0x22   : > { %s398_s16 = scalar_lea.vmem %s584_s29, 128  ;;  %s497_s17 = smov [#allocation2]  }
  0x23   : > { %p399_p2 = scmp.ne.s32.totalorder %s584_s29, %s398_s16  ;;  %s403_s22 = sshll.u32 %s497_s17, 4  ;;  %s404_s22 = int_to_ptr.vmem [resolvable:$false] %s403_s22 }
  0x24   : > { %s405_s23 = scalar_lea.vmem %s404_s22, 256  ;;  %p406_p9 = scmp.lt.s32.totalorder %s584_s29, %s404_s22 }
  0x25   : > { %p401_p5 = pnand %p399_p2, %p385_p3  ;;  %p407_p4 = scmp.lt.s32.totalorder %s405_s23, %s398_s16 }
  0x27   : > { %p402_p11 = pneg %p401_p5  ;;  %p408_p7 = por %p407_p4, %p406_p9 }
  0x29   : > { %p409_p10 = pnand %p408_p7, %p402_p11 }
  0x2b   : > { %412 = shalt.err (!%p409_p10)
}
  0x2c   : > { %s498_s24 = smov 64   ;;  %s499_s25 = smov 4  }
  0x2d   : > { %324 = dma.hbm_to_vmem [thread:$0]  (!%p588_p0), %s582_s27, 128, %s584_s29, %s593_s2, %s498_s24, %s498_s24, %s499_s25  }
  0x2e   : > { %p124_p12 = scmp.lt.s32.totalorder %s495_s11, 3  ;;  %p696_p1 = scmp.ge.s32.totalorder %s495_s11, 1 }
  0x30   : > { %p125_p3 = pnand %p696_p1, %p124_p12 }
  0x31   : > { %s625_s26 = sand.u32 (!%p125_p3), 1, %s479_s7  }
  0x32   : > { %128 = sbr.rel (%p125_p3) target bundleno = 86 (0x56), region = 24  ;;  %s302_s28 = sshll.u32 (!%p125_p3), %s625_s26, 3 }
  0x33   : > { %s131_s3 = scalar_lea.sflag (!%p125_p3), [#allocation3], %s625_s26  ;;  %s134_s4 = scalar_lea.vmem (!%p125_p3), [#allocation2], %s302_s28 }
  0x39   : > { %466 = dma.done.wait (%p560_p8), %s131_s3, 128  }
  0x3a   : > { %468 = vsyncadd (%p560_p8), %s131_s3, 4294967168  ;;  %v166_v0 = vlaneseq  ;;  %s152_s27 = scalar_lea.vmem [#allocation5], %s302_s28  ;;  %s316_s30 = sshll.u32 %s487_s9, 7 }
  0x3b   : > { %s207_s29 = sshll.u32 %s152_s27, 4  ;;  %v304_v1 = vld.sshfl [vmem:[%s134_s4] sm:$0x33 pattern:$0x75316420]  ;;  %s639_s5 = scalar_lea.hbm %s689_s1, %s316_s30  ;;  %s634_s29 = int_to_ptr.vmem [resolvable:$true] %s207_s29 }
  0x3c   : > { %vm168_vm0 = vcmp.lt.s32.totalorder %v166_v0, 256  ;;  %v163_v2 = vcombine.high %v304_v1, %v304_v1  ;;  %v307_v3 = vld.sshfl [vmem:[%s134_s4 + $0x4] sm:$0x33 pattern:$0x75316420]  ;;  %s191_s12 = scalar_lea.sflag [#allocation4], %s625_s26 }
  0x3d   : > { %170 = vst.msk [vmem:[%s152_s27] ss:$2 sm:$0x3] %vm168_vm0, %v304_v1  ;;  %v183_v4 = vcombine.high %v307_v3, %v307_v3  ;;  %308 = vst.msk [vmem:[%s152_s27 + $0x1] ss:$2 sm:$0x3] %vm168_vm0, %v307_v3 }
  0x3e   : > { %305 = vst.msk [vmem:[%s152_s27 + $0x4] ss:$2 sm:$0x3] %vm168_vm0, %v163_v2  ;;  %s413_s9 = scalar_lea.vmem %s634_s29, 128  ;;  %p697_p9 = scmp.ne.s32.totalorder %s693_s19, 0 }
  0x3f   : > { %309 = vst.msk [vmem:[%s152_s27 + $0x5] ss:$2 sm:$0x3] %vm168_vm0, %v183_v4  ;;  %p414_p8 = scmp.ne.s32.totalorder %s634_s29, %s413_s9  ;;  %s500_s13 = smov [#allocation5]  }
  0x40   : > { %s417_s15 = sshll.u32 %s500_s13, 4  ;;  %s418_s15 = int_to_ptr.vmem [resolvable:$false] %s417_s15 }
  0x41   : > { %p415_p11 = pnand %p414_p8, %p697_p9  ;;  %s419_s16 = scalar_lea.vmem %s418_s15, 256 }
  0x42   : > { %p420_p6 = scmp.lt.s32.totalorder %s634_s29, %s418_s15  ;;  %p421_p13 = scmp.lt.s32.totalorder %s419_s16, %s413_s9 }
  0x43   : > { %p416_p0 = pneg %p415_p11 }
  0x44   : > { %p422_p2 = por %p421_p13, %p420_p6 }
  0x46   : > { %p423_p5 = pnand %p422_p2, %p416_p0 }
  0x48   : > { %426 = shalt.err (!%p423_p5)
}
  0x49   : > { %s427_s17 = scalar_lea.hbm %s639_s5, 128  ;;  %s431_s24 = scalar_lea.hbm %s689_s1, 256 }
  0x4a   : > { %p428_p4 = scmp.ne.s32.totalorder %s639_s5, %s427_s17  ;;  %p432_p12 = scmp.lt.u32.totalorder %s639_s5, %s689_s1 }
  0x4b   : > { %p433_p1 = scmp.lt.u32.totalorder %s431_s24, %s427_s17  ;;  %p435_p8 = scmp.lt.u32.totalorder %s427_s17, %s639_s5 }
  0x4c   : > { %p429_p7 = pnand %p428_p4, %p697_p9 }
  0x4d   : > { %p434_p3 = por %p433_p1, %p432_p12 }
  0x4e   : > { %p430_p10 = pneg %p429_p7 }
  0x4f   : > { %p436_p11 = por %p435_p8, %p434_p3 }
  0x51   : > { %p437_p0 = pnand %p436_p11, %p430_p10 }
  0x53   : > { %440 = shalt.err (!%p437_p0)
}
  0x54   : > { %s501_s3 = smov 64   ;;  %s502_s4 = smov 4  }
  0x55   : > { %319 = dma.vmem_to_hbm [thread:$0]  (%p697_p9), %s634_s29, 128, %s639_s5, %s191_s12, %s501_s3, %s501_s3, %s502_s4  }
  0x56 PF: > { %s222_s27 = sand.u32 1, %s475_s6   ;;  %p698_p6 = scmp.ne.s32.totalorder %s694_s21, 0 }
  0x57   : > { %p699_p13 = scmp.ge.s32.totalorder %s495_s11, 2  ;;  %s223_s30 = scalar_lea.sflag [#allocation4], %s222_s27 }
  0x59   : > { %p326_p2 = pnand %p699_p13, %p698_p6 }
  0x5b   : > { %470 = dma.done.wait (!%p326_p2), %s223_s30, 128  }
  0x5c   : > { %472 = vsyncadd (!%p326_p2), %s223_s30, 4294967168  ;;  %s17_s11 = sadd.s32 1, %s495_s11   ;;  %s700_s6 = smov %s479_s7 }
  0x5d   : > { %p14_p5 = scmp.ge.s32.totalorder %s17_s11, 4   ;;  %s701_s7 = smov %s483_s8 }
  0x5e   : > { %s702_s8 = smov %s569_s20  ;;  %s703_s9 = smov %s491_s10 }
  0x5f   : > { %s704_s10 = smov %s706_s14  ;;  %16 = sbr.rel (!%p14_p5) target bundleno = 6 (0x6), region = 73 }
  0x66   :  { %228 = vsyncpa [#allocation3], 1 }
  0x67   :  { %230 = vsyncpa [#allocation3 + $0x1], 1 }
  0x68   :  { %231 = vsyncpa [#allocation4], 1 }
  0x69   :  { %233 = vsyncpa [#allocation4 + $0x1], 1 }

</bundles_post_ra>
